<compile_context>
chip_gen: v7x
topology: tpu7x:2x2x1
jax: 0.10.0
libtpu: 0.0.40
codegen_flags: <defaults>
</compile_context>

<pallas_src>
import math
from functools import partial

import jax
import jax.numpy as jnp
from jax import lax
from jax.experimental import pallas as pl
from jax.experimental.pallas import tpu as pltpu

# ---- small, module-consistent hyper parameters ------------------------------
B = 2            # batch
T1 = 16          # query (decoder) length
T2 = 24          # memory (encoder) length
N_FEAT = 32      # model feature size (= h * d_k)
N_HEAD = 4       # heads
D_K = N_FEAT // N_HEAD


def cross_attn_kernel(x_ref, mem_ref, mask_ref,
                      wqT_ref, wkvT_ref, woT_ref,
                      bq_ref, bkv_ref, bo_ref,
                      out_ref, *, n_feat, n_head, d_k):
    """Single grid step over the whole (tiny) problem.

    x_ref:    (B*T1, n_feat)        query tokens, batch-flattened
    mem_ref:  (B*T2, n_feat)        memory tokens, batch-flattened
    mask_ref: (B*T1, B*T2)          combined additive bias (memory mask on
                                    same-batch blocks, -1e9 cross-batch)
    wqT_ref:  (n_feat, n_feat)      pre-transposed linear_q weight
    wkvT_ref: (n_feat, 2*n_feat)    pre-transposed fused linear_k_v weight,
                                    columns interleaved per head [k_h|v_h]
    woT_ref:  (n_feat, n_feat)      pre-transposed linear_out weight
    b*_ref:   (1, n_feat) / (1, 2*n_feat)   (bkv interleaved like wkvT)
    out_ref:  (B*T1, n_feat)
    """
    scale = jnp.float32(1.0 / math.sqrt(d_k))

    # ---- fused projections on the batch-flattened tokens (one MXU push each)
    # 1/sqrt(d_k) folded into q once, full lane width.
    q_all = (jnp.dot(x_ref[...], wqT_ref[...],
                     preferred_element_type=jnp.float32)
             + bq_ref[...]) * scale                        # (B*T1, n_feat)
    kv_all = jnp.dot(mem_ref[...], wkvT_ref[...],
                     preferred_element_type=jnp.float32) + bkv_ref[...]
    # kv_all: (B*T2, 2*n_feat), per-head layout [k_h0 | v_h0 | k_h1 | v_h1 ..]

    bias = mask_ref[...]                                   # (B*T1, B*T2)

    ctx_parts = []
    for h in range(n_head):
        qo = h * d_k
        kvo = h * 2 * d_k
        qh = q_all[:, qo:qo + d_k]                         # (B*T1, d_k)
        kh = kv_all[:, kvo:kvo + d_k]                      # (B*T2, d_k)
        vh = kv_all[:, kvo + d_k:kvo + 2 * d_k]            # (B*T2, d_k)

        # scores: contract on the last axis of both operands (no kh.T)
        s = lax.dot_general(qh, kh, (((1,), (1,)), ((), ())),
                            preferred_element_type=jnp.float32)  # (BT1, BT2)
        s = s + bias                                       # additive mask

        # numerically-stable softmax; reciprocal on the EUP
        s_max = jnp.max(s, axis=-1, keepdims=True)
        p = jnp.exp(s - s_max)
        denom = jnp.sum(p, axis=-1, keepdims=True)
        r = pl.reciprocal(denom, approx=True)
        r = r * (2.0 - denom * r)                          # one Newton step
        attn = p * r

        ctx_parts.append(jnp.dot(attn, vh,
                                 preferred_element_type=jnp.float32))

    # assemble per-head contexts lane-wise, then one 32-deep output projection
    ctx = jnp.concatenate(ctx_parts, axis=-1)              # (B*T1, n_feat)
    out_ref[...] = (jnp.dot(ctx, woT_ref[...],
                            preferred_element_type=jnp.float32)
                    + bo_ref[...]).astype(out_ref.dtype)


@jax.jit
def cross_attn_forward(x, memory, mask, wq, bq, wkv, bkv, wo, bo):
    """x: (B,T1,n_feat), memory: (B,T2,n_feat), mask: (B,T2) additive bias.

    Weights are in PyTorch Linear layout ((out, in)); they are transposed /
    re-laid-out once here (outside the kernel) so the kernel never transposes.
    """
    b, t1, n_feat = x.shape
    t2 = memory.shape[1]
    n_head, d_k = N_HEAD, D_K

    # host-side layout prep (outside the Pallas kernel)
    wqT = wq.T                                             # (n_feat, n_feat)
    woT = wo.T                                             # (n_feat, n_feat)

    # fused K/V weight, transposed and head-interleaved:
    # columns = [k_h0 (d_k) | v_h0 (d_k) | k_h1 | v_h1 | ...]
    wkvT = wkv.T                                           # (n_feat, 2*n_feat)
    kT = wkvT[:, :n_feat].reshape(n_feat, n_head, d_k)
    vT = wkvT[:, n_feat:].reshape(n_feat, n_head, d_k)
    wkvT_int = jnp.concatenate([kT, vT], axis=-1).reshape(n_feat, 2 * n_feat)
    bkv_int = jnp.concatenate(
        [bkv[:n_feat].reshape(n_head, d_k),
         bkv[n_feat:].reshape(n_head, d_k)], axis=-1).reshape(1, 2 * n_feat)

    x2d = x.reshape(b * t1, n_feat)
    mem2d = memory.reshape(b * t2, n_feat)
    bq2 = bq.reshape(1, n_feat)
    bo2 = bo.reshape(1, n_feat)

    # combined additive mask (B*T1, B*T2): memory mask on same-batch blocks,
    # -1e9 on cross-batch blocks so the flattened softmax matches per-batch.
    big_neg = jnp.float32(-1e9)
    same = jnp.eye(b, dtype=bool)[:, None, :, None]        # (B,1,B,1)
    mask4 = jnp.broadcast_to(mask[None, None, :, :], (b, t1, b, t2))
    comb_mask = jnp.where(same, mask4, big_neg).reshape(b * t1, b * t2)

    kernel = partial(cross_attn_kernel,
                     n_feat=n_feat, n_head=n_head, d_k=d_k)

    full = lambda shape: pl.BlockSpec(shape, lambda i: (0,) * len(shape))

    out2d = pl.pallas_call(
        kernel,
        out_shape=jax.ShapeDtypeStruct((b * t1, n_feat), jnp.float32),
        grid_spec=pltpu.PrefetchScalarGridSpec(
            num_scalar_prefetch=0,
            grid=(1,),                          # single step: grid collapsed
            in_specs=[
                full((b * t1, n_feat)),         # x (flattened)
                full((b * t2, n_feat)),         # memory (flattened)
                full((b * t1, b * t2)),         # combined additive mask
                full((n_feat, n_feat)),         # wqT
                full((n_feat, 2 * n_feat)),     # wkvT (head-interleaved)
                full((n_feat, n_feat)),         # woT
                full((1, n_feat)),              # bq
                full((1, 2 * n_feat)),          # bkv (head-interleaved)
                full((1, n_feat)),              # bo
            ],
            out_specs=full((b * t1, n_feat)),
        ),
        compiler_params=pltpu.CompilerParams(
            dimension_semantics=("arbitrary",)),
    )(x2d, mem2d, comb_mask, wqT, wkvT_int, woT, bq2, bkv_int, bo2)

    return out2d.reshape(b, t1, n_feat)


def reference_forward(x, memory, mask, wq, bq, wkv, bkv, wo, bo):
    """Plain-JAX mirror of the PyTorch forward (ret_attn=False path)."""
    b, t1, n_feat = x.shape
    t2 = memory.shape[1]
    q = x @ wq.T + bq
    kv = memory @ wkv.T + bkv
    k, v = kv[..., :n_feat], kv[..., n_feat:]

    def split_heads(a, t):
        return a.reshape(b, t, N_HEAD, D_K).transpose(0, 2, 1, 3)

    qh, kh, vh = split_heads(q, t1), split_heads(k, t2), split_heads(v, t2)
    scores = jnp.einsum('bhqd,bhkd->bhqk', qh, kh) / math.sqrt(D_K)
    scores = scores + mask[:, None, None, :]          # additive mask
    attn = jax.nn.softmax(scores, axis=-1)
    ctx = jnp.einsum('bhqk,bhkd->bhqd', attn, vh)
    ctx = ctx.transpose(0, 2, 1, 3).reshape(b, t1, n_feat)
    return ctx @ wo.T + bo


if __name__ == "__main__":
    key = jax.random.PRNGKey(0)
    ks = jax.random.split(key, 8)

    # parameters in PyTorch Linear layout: weight (out, in), bias (out,)
    wq = jax.random.normal(ks[0], (N_FEAT, N_FEAT), jnp.float32) * 0.1
    bq = jax.random.normal(ks[1], (N_FEAT,), jnp.float32) * 0.01
    wkv = jax.random.normal(ks[2], (2 * N_FEAT, N_FEAT), jnp.float32) * 0.1
    bkv = jax.random.normal(ks[3], (2 * N_FEAT,), jnp.float32) * 0.01
    wo = jax.random.normal(ks[4], (N_FEAT, N_FEAT), jnp.float32) * 0.1
    bo = jax.random.normal(ks[5], (N_FEAT,), jnp.float32) * 0.01

    # inputs
    x = jax.random.normal(ks[6], (B, T1, N_FEAT), jnp.float32)
    memory = jax.random.normal(ks[7], (B, T2, N_FEAT), jnp.float32)

    # additive memory mask (as the export module expects): 0 = attend,
    # large-negative = masked.  Finite value (not -inf) for defined arithmetic.
    keep = jnp.ones((B, T2), jnp.float32)
    keep = keep.at[1, T2 - 6:].set(0.0)
    mask = (1.0 - keep) * jnp.float32(-1e9)

    out = cross_attn_forward(x, memory, mask, wq, bq, wkv, bkv, wo, bo)
    out = jax.block_until_ready(out)

    ref = reference_forward(x, memory, mask, wq, bq, wkv, bkv, wo, bo)
    assert out.shape == (B, T1, N_FEAT)
    max_err = jnp.max(jnp.abs(out - ref))
    assert jnp.allclose(out, ref, atol=1e-3, rtol=1e-3), \
        f"mismatch vs reference: max|delta|={max_err}"

    print("KERNEL_OK")
</pallas_src>

<mosaic_0001>
module attributes {stable_mosaic.version = 11 : i64} {
  func.func @cross_attn_kernel(%arg0: i32, %arg1: memref<32x32xf32, #tpu.memory_space<vmem>>, %arg2: memref<48x32xf32, #tpu.memory_space<vmem>>, %arg3: memref<32x48xf32, #tpu.memory_space<vmem>>, %arg4: memref<32x32xf32, #tpu.memory_space<vmem>>, %arg5: memref<32x64xf32, #tpu.memory_space<vmem>>, %arg6: memref<32x32xf32, #tpu.memory_space<vmem>>, %arg7: memref<1x32xf32, #tpu.memory_space<vmem>>, %arg8: memref<1x64xf32, #tpu.memory_space<vmem>>, %arg9: memref<1x32xf32, #tpu.memory_space<vmem>>, %arg10: memref<32x32xf32, #tpu.memory_space<vmem>>) attributes {dimension_semantics = [#tpu.dimension_semantics<arbitrary>], iteration_bounds = array<i64: 1>, scalar_prefetch = 0 : i64, scratch_operands = 0 : i64, tpu.core_type = #tpu.core_type<tc>, window_params = [{pipeline_mode = #tpu.pipeline_mode<synchronous>, transform_indices = @transform_0, window_bounds = array<i64: 32, 32>}, {pipeline_mode = #tpu.pipeline_mode<synchronous>, transform_indices = @transform_1, window_bounds = array<i64: 48, 32>}, {pipeline_mode = #tpu.pipeline_mode<synchronous>, transform_indices = @transform_2, window_bounds = array<i64: 32, 48>}, {pipeline_mode = #tpu.pipeline_mode<synchronous>, transform_indices = @transform_3, window_bounds = array<i64: 32, 32>}, {pipeline_mode = #tpu.pipeline_mode<synchronous>, transform_indices = @transform_4, window_bounds = array<i64: 32, 64>}, {pipeline_mode = #tpu.pipeline_mode<synchronous>, transform_indices = @transform_5, window_bounds = array<i64: 32, 32>}, {pipeline_mode = #tpu.pipeline_mode<synchronous>, transform_indices = @transform_6, window_bounds = array<i64: 1, 32>}, {pipeline_mode = #tpu.pipeline_mode<synchronous>, transform_indices = @transform_7, window_bounds = array<i64: 1, 64>}, {pipeline_mode = #tpu.pipeline_mode<synchronous>, transform_indices = @transform_8, window_bounds = array<i64: 1, 32>}, {pipeline_mode = #tpu.pipeline_mode<synchronous>, transform_indices = @transform_9, window_bounds = array<i64: 32, 32>}]} {
    %c0 = arith.constant 0 : index
    %c0_0 = arith.constant 0 : index
    %0 = vector.load %arg1[%c0, %c0_0] : memref<32x32xf32, #tpu.memory_space<vmem>>, vector<32x32xf32>
    %c0_1 = arith.constant 0 : index
    %c0_2 = arith.constant 0 : index
    %1 = vector.load %arg4[%c0_1, %c0_2] : memref<32x32xf32, #tpu.memory_space<vmem>>, vector<32x32xf32>
    %cst = arith.constant dense<0.000000e+00> : vector<32x32xf32>
    %2 = tpu.matmul %0, %1, %cst {dimension_numbers = #tpu.dot_dimension_numbers<[1], [0], [0], [1], [0, 0, 1, 1], [], []>} : vector<32x32xf32>, vector<32x32xf32>, vector<32x32xf32> -> vector<32x32xf32>
    %c0_3 = arith.constant 0 : index
    %c0_4 = arith.constant 0 : index
    %3 = vector.load %arg7[%c0_3, %c0_4] : memref<1x32xf32, #tpu.memory_space<vmem>>, vector<1x32xf32>
    %4 = vector.broadcast %3 : vector<1x32xf32> to vector<32x32xf32>
    %5 = arith.addf %2, %4 : vector<32x32xf32>
    %cst_5 = arith.constant 0.353553385 : f32
    %6 = vector.broadcast %cst_5 : f32 to vector<32x32xf32>
    %7 = arith.mulf %5, %6 : vector<32x32xf32>
    %c0_6 = arith.constant 0 : index
    %c0_7 = arith.constant 0 : index
    %8 = vector.load %arg2[%c0_6, %c0_7] : memref<48x32xf32, #tpu.memory_space<vmem>>, vector<48x32xf32>
    %c0_8 = arith.constant 0 : index
    %c0_9 = arith.constant 0 : index
    %9 = vector.load %arg5[%c0_8, %c0_9] : memref<32x64xf32, #tpu.memory_space<vmem>>, vector<32x64xf32>
    %cst_10 = arith.constant dense<0.000000e+00> : vector<48x64xf32>
    %10 = tpu.matmul %8, %9, %cst_10 {dimension_numbers = #tpu.dot_dimension_numbers<[1], [0], [0], [1], [0, 0, 1, 1], [], []>} : vector<48x32xf32>, vector<32x64xf32>, vector<48x64xf32> -> vector<48x64xf32>
    %c0_11 = arith.constant 0 : index
    %c0_12 = arith.constant 0 : index
    %11 = vector.load %arg8[%c0_11, %c0_12] : memref<1x64xf32, #tpu.memory_space<vmem>>, vector<1x64xf32>
    %12 = vector.broadcast %11 : vector<1x64xf32> to vector<48x64xf32>
    %13 = arith.addf %10, %12 : vector<48x64xf32>
    %c0_13 = arith.constant 0 : index
    %c0_14 = arith.constant 0 : index
    %14 = vector.load %arg3[%c0_13, %c0_14] : memref<32x48xf32, #tpu.memory_space<vmem>>, vector<32x48xf32>
    %15 = vector.extract_strided_slice %7 {offsets = [0, 0], sizes = [32, 8], strides = [1, 1]} : vector<32x32xf32> to vector<32x8xf32>
    %16 = vector.extract_strided_slice %13 {offsets = [0, 0], sizes = [48, 8], strides = [1, 1]} : vector<48x64xf32> to vector<48x8xf32>
    %17 = vector.extract_strided_slice %13 {offsets = [0, 8], sizes = [48, 8], strides = [1, 1]} : vector<48x64xf32> to vector<48x8xf32>
    %cst_15 = arith.constant dense<0.000000e+00> : vector<32x48xf32>
    %18 = tpu.matmul %15, %16, %cst_15 {dimension_numbers = #tpu.dot_dimension_numbers<[1], [1], [0], [0], [0, 0, 1, 0], [], []>} : vector<32x8xf32>, vector<48x8xf32>, vector<32x48xf32> -> vector<32x48xf32>
    %19 = arith.addf %18, %14 : vector<32x48xf32>
    %cst_16 = arith.constant dense<0xFF800000> : vector<32xf32>
    %20 = vector.multi_reduction <maximumf>, %19, %cst_16 [1] : vector<32x48xf32> to vector<32xf32>
    %21 = vector.shape_cast %20 : vector<32xf32> to vector<32x1xf32>
    %22 = vector.broadcast %21 : vector<32x1xf32> to vector<32x48xf32>
    %23 = arith.subf %19, %22 : vector<32x48xf32>
    %24 = math.exp %23 : vector<32x48xf32>
    %cst_17 = arith.constant dense<0.000000e+00> : vector<32xf32>
    %25 = vector.multi_reduction <add>, %24, %cst_17 [1] : vector<32x48xf32> to vector<32xf32>
    %26 = vector.shape_cast %25 : vector<32xf32> to vector<32x1xf32>
    %27 = tpu.reciprocal %26 {approx = true} : vector<32x1xf32> -> vector<32x1xf32>
    %28 = arith.mulf %26, %27 : vector<32x1xf32>
    %cst_18 = arith.constant 2.000000e+00 : f32
    %29 = vector.broadcast %cst_18 : f32 to vector<32x1xf32>
    %30 = arith.subf %29, %28 : vector<32x1xf32>
    %31 = arith.mulf %27, %30 : vector<32x1xf32>
    %32 = vector.broadcast %31 : vector<32x1xf32> to vector<32x48xf32>
    %33 = arith.mulf %24, %32 : vector<32x48xf32>
    %cst_19 = arith.constant dense<0.000000e+00> : vector<32x8xf32>
    %34 = tpu.matmul %33, %17, %cst_19 {dimension_numbers = #tpu.dot_dimension_numbers<[1], [0], [0], [1], [0, 0, 1, 1], [], []>} : vector<32x48xf32>, vector<48x8xf32>, vector<32x8xf32> -> vector<32x8xf32>
    %35 = vector.extract_strided_slice %7 {offsets = [0, 8], sizes = [32, 8], strides = [1, 1]} : vector<32x32xf32> to vector<32x8xf32>
    %36 = vector.extract_strided_slice %13 {offsets = [0, 16], sizes = [48, 8], strides = [1, 1]} : vector<48x64xf32> to vector<48x8xf32>
    %37 = vector.extract_strided_slice %13 {offsets = [0, 24], sizes = [48, 8], strides = [1, 1]} : vector<48x64xf32> to vector<48x8xf32>
    %cst_20 = arith.constant dense<0.000000e+00> : vector<32x48xf32>
    %38 = tpu.matmul %35, %36, %cst_20 {dimension_numbers = #tpu.dot_dimension_numbers<[1], [1], [0], [0], [0, 0, 1, 0], [], []>} : vector<32x8xf32>, vector<48x8xf32>, vector<32x48xf32> -> vector<32x48xf32>
    %39 = arith.addf %38, %14 : vector<32x48xf32>
    %cst_21 = arith.constant dense<0xFF800000> : vector<32xf32>
    %40 = vector.multi_reduction <maximumf>, %39, %cst_21 [1] : vector<32x48xf32> to vector<32xf32>
    %41 = vector.shape_cast %40 : vector<32xf32> to vector<32x1xf32>
    %42 = vector.broadcast %41 : vector<32x1xf32> to vector<32x48xf32>
    %43 = arith.subf %39, %42 : vector<32x48xf32>
    %44 = math.exp %43 : vector<32x48xf32>
    %cst_22 = arith.constant dense<0.000000e+00> : vector<32xf32>
    %45 = vector.multi_reduction <add>, %44, %cst_22 [1] : vector<32x48xf32> to vector<32xf32>
    %46 = vector.shape_cast %45 : vector<32xf32> to vector<32x1xf32>
    %47 = tpu.reciprocal %46 {approx = true} : vector<32x1xf32> -> vector<32x1xf32>
    %48 = arith.mulf %46, %47 : vector<32x1xf32>
    %cst_23 = arith.constant 2.000000e+00 : f32
    %49 = vector.broadcast %cst_23 : f32 to vector<32x1xf32>
    %50 = arith.subf %49, %48 : vector<32x1xf32>
    %51 = arith.mulf %47, %50 : vector<32x1xf32>
    %52 = vector.broadcast %51 : vector<32x1xf32> to vector<32x48xf32>
    %53 = arith.mulf %44, %52 : vector<32x48xf32>
    %cst_24 = arith.constant dense<0.000000e+00> : vector<32x8xf32>
    %54 = tpu.matmul %53, %37, %cst_24 {dimension_numbers = #tpu.dot_dimension_numbers<[1], [0], [0], [1], [0, 0, 1, 1], [], []>} : vector<32x48xf32>, vector<48x8xf32>, vector<32x8xf32> -> vector<32x8xf32>
    %55 = vector.extract_strided_slice %7 {offsets = [0, 16], sizes = [32, 8], strides = [1, 1]} : vector<32x32xf32> to vector<32x8xf32>
    %56 = vector.extract_strided_slice %13 {offsets = [0, 32], sizes = [48, 8], strides = [1, 1]} : vector<48x64xf32> to vector<48x8xf32>
    %57 = vector.extract_strided_slice %13 {offsets = [0, 40], sizes = [48, 8], strides = [1, 1]} : vector<48x64xf32> to vector<48x8xf32>
    %cst_25 = arith.constant dense<0.000000e+00> : vector<32x48xf32>
    %58 = tpu.matmul %55, %56, %cst_25 {dimension_numbers = #tpu.dot_dimension_numbers<[1], [1], [0], [0], [0, 0, 1, 0], [], []>} : vector<32x8xf32>, vector<48x8xf32>, vector<32x48xf32> -> vector<32x48xf32>
    %59 = arith.addf %58, %14 : vector<32x48xf32>
    %cst_26 = arith.constant dense<0xFF800000> : vector<32xf32>
    %60 = vector.multi_reduction <maximumf>, %59, %cst_26 [1] : vector<32x48xf32> to vector<32xf32>
    %61 = vector.shape_cast %60 : vector<32xf32> to vector<32x1xf32>
    %62 = vector.broadcast %61 : vector<32x1xf32> to vector<32x48xf32>
    %63 = arith.subf %59, %62 : vector<32x48xf32>
    %64 = math.exp %63 : vector<32x48xf32>
    %cst_27 = arith.constant dense<0.000000e+00> : vector<32xf32>
    %65 = vector.multi_reduction <add>, %64, %cst_27 [1] : vector<32x48xf32> to vector<32xf32>
    %66 = vector.shape_cast %65 : vector<32xf32> to vector<32x1xf32>
    %67 = tpu.reciprocal %66 {approx = true} : vector<32x1xf32> -> vector<32x1xf32>
    %68 = arith.mulf %66, %67 : vector<32x1xf32>
    %cst_28 = arith.constant 2.000000e+00 : f32
    %69 = vector.broadcast %cst_28 : f32 to vector<32x1xf32>
    %70 = arith.subf %69, %68 : vector<32x1xf32>
    %71 = arith.mulf %67, %70 : vector<32x1xf32>
    %72 = vector.broadcast %71 : vector<32x1xf32> to vector<32x48xf32>
    %73 = arith.mulf %64, %72 : vector<32x48xf32>
    %cst_29 = arith.constant dense<0.000000e+00> : vector<32x8xf32>
    %74 = tpu.matmul %73, %57, %cst_29 {dimension_numbers = #tpu.dot_dimension_numbers<[1], [0], [0], [1], [0, 0, 1, 1], [], []>} : vector<32x48xf32>, vector<48x8xf32>, vector<32x8xf32> -> vector<32x8xf32>
    %75 = vector.extract_strided_slice %7 {offsets = [0, 24], sizes = [32, 8], strides = [1, 1]} : vector<32x32xf32> to vector<32x8xf32>
    %76 = vector.extract_strided_slice %13 {offsets = [0, 48], sizes = [48, 8], strides = [1, 1]} : vector<48x64xf32> to vector<48x8xf32>
    %77 = vector.extract_strided_slice %13 {offsets = [0, 56], sizes = [48, 8], strides = [1, 1]} : vector<48x64xf32> to vector<48x8xf32>
    %cst_30 = arith.constant dense<0.000000e+00> : vector<32x48xf32>
    %78 = tpu.matmul %75, %76, %cst_30 {dimension_numbers = #tpu.dot_dimension_numbers<[1], [1], [0], [0], [0, 0, 1, 0], [], []>} : vector<32x8xf32>, vector<48x8xf32>, vector<32x48xf32> -> vector<32x48xf32>
    %79 = arith.addf %78, %14 : vector<32x48xf32>
    %cst_31 = arith.constant dense<0xFF800000> : vector<32xf32>
    %80 = vector.multi_reduction <maximumf>, %79, %cst_31 [1] : vector<32x48xf32> to vector<32xf32>
    %81 = vector.shape_cast %80 : vector<32xf32> to vector<32x1xf32>
    %82 = vector.broadcast %81 : vector<32x1xf32> to vector<32x48xf32>
    %83 = arith.subf %79, %82 : vector<32x48xf32>
    %84 = math.exp %83 : vector<32x48xf32>
    %cst_32 = arith.constant dense<0.000000e+00> : vector<32xf32>
    %85 = vector.multi_reduction <add>, %84, %cst_32 [1] : vector<32x48xf32> to vector<32xf32>
    %86 = vector.shape_cast %85 : vector<32xf32> to vector<32x1xf32>
    %87 = tpu.reciprocal %86 {approx = true} : vector<32x1xf32> -> vector<32x1xf32>
    %88 = arith.mulf %86, %87 : vector<32x1xf32>
    %cst_33 = arith.constant 2.000000e+00 : f32
    %89 = vector.broadcast %cst_33 : f32 to vector<32x1xf32>
    %90 = arith.subf %89, %88 : vector<32x1xf32>
    %91 = arith.mulf %87, %90 : vector<32x1xf32>
    %92 = vector.broadcast %91 : vector<32x1xf32> to vector<32x48xf32>
    %93 = arith.mulf %84, %92 : vector<32x48xf32>
    %cst_34 = arith.constant dense<0.000000e+00> : vector<32x8xf32>
    %94 = tpu.matmul %93, %77, %cst_34 {dimension_numbers = #tpu.dot_dimension_numbers<[1], [0], [0], [1], [0, 0, 1, 1], [], []>} : vector<32x48xf32>, vector<48x8xf32>, vector<32x8xf32> -> vector<32x8xf32>
    %95 = tpu.concatenate %34, %54, %74, %94 in 1 : vector<32x8xf32>, vector<32x8xf32>, vector<32x8xf32>, vector<32x8xf32> -> vector<32x32xf32>
    %c0_35 = arith.constant 0 : index
    %c0_36 = arith.constant 0 : index
    %96 = vector.load %arg6[%c0_35, %c0_36] : memref<32x32xf32, #tpu.memory_space<vmem>>, vector<32x32xf32>
    %cst_37 = arith.constant dense<0.000000e+00> : vector<32x32xf32>
    %97 = tpu.matmul %95, %96, %cst_37 {dimension_numbers = #tpu.dot_dimension_numbers<[1], [0], [0], [1], [0, 0, 1, 1], [], []>} : vector<32x32xf32>, vector<32x32xf32>, vector<32x32xf32> -> vector<32x32xf32>
    %c0_38 = arith.constant 0 : index
    %c0_39 = arith.constant 0 : index
    %98 = vector.load %arg9[%c0_38, %c0_39] : memref<1x32xf32, #tpu.memory_space<vmem>>, vector<1x32xf32>
    %99 = vector.broadcast %98 : vector<1x32xf32> to vector<32x32xf32>
    %100 = arith.addf %97, %99 : vector<32x32xf32>
    %c0_40 = arith.constant 0 : index
    %c0_41 = arith.constant 0 : index
    %101 = vector.load %arg10[%c0_40, %c0_41] : memref<32x32xf32, #tpu.memory_space<vmem>>, vector<32x32xf32>
    tpu.vector_store %arg10[%c0_40, %c0_41], %100 {strides = array<i32>} : memref<32x32xf32, #tpu.memory_space<vmem>>, vector<32x32xf32>,
    return
  }
  func.func @transform_0(%arg0: i32) -> (i32, i32) {
    %c0_i32 = arith.constant 0 : i32
    %c0_i32_0 = arith.constant 0 : i32
    %c0_i32_1 = arith.constant 0 : i32
    return %c0_i32, %c0_i32_0 : i32, i32
  }
  func.func @transform_1(%arg0: i32) -> (i32, i32) {
    %c0_i32 = arith.constant 0 : i32
    %c0_i32_0 = arith.constant 0 : i32
    %c0_i32_1 = arith.constant 0 : i32
    return %c0_i32, %c0_i32_0 : i32, i32
  }
  func.func @transform_2(%arg0: i32) -> (i32, i32) {
    %c0_i32 = arith.constant 0 : i32
    %c0_i32_0 = arith.constant 0 : i32
    %c0_i32_1 = arith.constant 0 : i32
    return %c0_i32, %c0_i32_0 : i32, i32
  }
  func.func @transform_3(%arg0: i32) -> (i32, i32) {
    %c0_i32 = arith.constant 0 : i32
    %c0_i32_0 = arith.constant 0 : i32
    %c0_i32_1 = arith.constant 0 : i32
    return %c0_i32, %c0_i32_0 : i32, i32
  }
  func.func @transform_4(%arg0: i32) -> (i32, i32) {
    %c0_i32 = arith.constant 0 : i32
    %c0_i32_0 = arith.constant 0 : i32
    %c0_i32_1 = arith.constant 0 : i32
    return %c0_i32, %c0_i32_0 : i32, i32
  }
  func.func @transform_5(%arg0: i32) -> (i32, i32) {
    %c0_i32 = arith.constant 0 : i32
    %c0_i32_0 = arith.constant 0 : i32
    %c0_i32_1 = arith.constant 0 : i32
    return %c0_i32, %c0_i32_0 : i32, i32
  }
  func.func @transform_6(%arg0: i32) -> (i32, i32) {
    %c0_i32 = arith.constant 0 : i32
    %c0_i32_0 = arith.constant 0 : i32
    %c0_i32_1 = arith.constant 0 : i32
    return %c0_i32, %c0_i32_0 : i32, i32
  }
  func.func @transform_7(%arg0: i32) -> (i32, i32) {
    %c0_i32 = arith.constant 0 : i32
    %c0_i32_0 = arith.constant 0 : i32
    %c0_i32_1 = arith.constant 0 : i32
    return %c0_i32, %c0_i32_0 : i32, i32
  }
  func.func @transform_8(%arg0: i32) -> (i32, i32) {
    %c0_i32 = arith.constant 0 : i32
    %c0_i32_0 = arith.constant 0 : i32
    %c0_i32_1 = arith.constant 0 : i32
    return %c0_i32, %c0_i32_0 : i32, i32
  }
  func.func @transform_9(%arg0: i32) -> (i32, i32) {
    %c0_i32 = arith.constant 0 : i32
    %c0_i32_0 = arith.constant 0 : i32
    %c0_i32_1 = arith.constant 0 : i32
    return %c0_i32, %c0_i32_0 : i32, i32
  }
}

</mosaic_0001>

<bundles_post_ra>
// kernel: cross_attn_forward.1
= control target key start
LH: loop header
LB: loop body
LE: loop exit
PB: predicated region body
PF: predicated region fallthrough
CT: control target
= control target key end

     0   :  { %vm48_vm0 = vcmask 261120   ;;  %s2832_s0 = inlined_call_operand.vmem [shape: f32[32,32], index: 0, kind: input, shape index: {}]   ;;  %s2833_s1 = inlined_call_operand.vmem [shape: f32[48,32], index: 1, kind: input, shape index: {}]   ;;  %s2834_s2 = inlined_call_operand.vmem [shape: f32[32,48], index: 2, kind: input, shape index: {}]   ;;  %s2835_s3 = inlined_call_operand.vmem [shape: f32[32,32], index: 3, kind: input, shape index: {}]   ;;  %s2836_s4 = inlined_call_operand.vmem [shape: f32[32,64], index: 4, kind: input, shape index: {}]   ;;  %s2837_s5 = inlined_call_operand.vmem [shape: f32[32,32], index: 5, kind: input, shape index: {}]   ;;  %s2838_s6 = inlined_call_operand.vmem [shape: f32[1,32], index: 6, kind: input, shape index: {}]   ;;  %s2839_s7 = inlined_call_operand.vmem [shape: f32[1,64], index: 7, kind: input, shape index: {}]   ;;  %s2840_s8 = inlined_call_operand.vmem [shape: f32[1,32], index: 8, kind: input, shape index: {}]   ;;  %s2841_s9 = inlined_call_operand.hbm [shape: f32[32,32], index: 9, kind: output, shape index: {}]  }
   0x1   :  { %v156_v0 = vld [vmem:[%s2836_s4] sm:$0xff]  ;;  %v157_v1 = vld [vmem:[%s2836_s4 + $0x8] sm:$0xff]  ;;  %v158_v2 = vld [vmem:[%s2836_s4 + $0x10] sm:$0xff] }
   0x2   :  { %v2026_v3 = vpack.c.bf16 %v157_v1, %v156_v0  ;;  %v159_v4 = vld [vmem:[%s2836_s4 + $0x18] sm:$0xff]  ;;  %v150_v5 = vld [vmem:[%s2833_s1] sm:$0xff]  ;;  %v38_v8 = vld [vmem:[%s2835_s3 + $0x8] sm:$0xff] }
   0x3   :  { %v2030_v6 = vpack.c.bf16 %v159_v4, %v158_v2  ;;  %1851 = vmatprep.mubr.msk.f32.mxu1 %vm48_vm0, %v150_v5  ;;  %v37_v7 = vld [vmem:[%s2835_s3] sm:$0xff]  ;;  %v39_v10 = vld [vmem:[%s2835_s3 + $0x10] sm:$0xff]  ;;  %v40_v11 = vld [vmem:[%s2835_s3 + $0x18] sm:$0xff] }
   0x4   :  { %2027 = vmatprep.subr.bf16.mxu1 %v2026_v3  ;;  %v2018_v9 = vpack.c.bf16 %v38_v8, %v37_v7  ;;  %v33_v12 = vld [vmem:[%s2832_s0] sm:$0xff]  ;;  %v2022_v13 = vpack.c.bf16 %v40_v11, %v39_v10 }
   0x5   :  { %2029 = vmatpush3.bf16.msra.mxu1 %v2026_v3  ;;  %1837 = vmatprep.mubr.msk.f32.mxu0 %vm48_vm0, %v33_v12 }
   0x6   :  { %2031 = vmatprep.subr.bf16.mxu1 %v2030_v6  ;;  %2019 = vmatprep.subr.bf16.mxu0 %v2018_v9 }
   0x7   :  { %14 = vsyncpa [#allocation3], 0  ;;  %2021 = vmatpush3.bf16.msra.mxu0 %v2018_v9  ;;  %v151_v14 = vld [vmem:[%s2833_s1 + $0x8] sm:$0xff]  ;;  %v152_v15 = vld [vmem:[%s2833_s1 + $0x10] sm:$0xff]  ;;  %vm284_vm1 = vcmask 64512   ;;  %vm400_vm3 = vcmask 392192  }
   0x8   :  { %2023 = vmatprep.subr.bf16.mxu0 %v2022_v13  ;;  %v34_v16 = vld [vmem:[%s2832_s0 + $0x8] sm:$0xff]  ;;  %v153_v17 = vld [vmem:[%s2833_s1 + $0x18] sm:$0xff]  ;;  %v35_v18 = vld [vmem:[%s2832_s0 + $0x10] sm:$0xff]  ;;  %s2372_s29 = smov 112   ;;  %s2373_s30 = smov 104   ;;  %vm1517_vm4 = vcmask 195584  }
   0x9   :  { %2033 = vmatpush3.bf16.msra.mxu1 %v2030_v6  ;;  %v154_v19 = vld [vmem:[%s2833_s1 + $0x20] sm:$0xff]  ;;  %v36_v20 = vld [vmem:[%s2832_s0 + $0x18] sm:$0xff]  ;;  %v155_v21 = vld [vmem:[%s2833_s1 + $0x28] sm:$0xff]  ;;  %s2374_s10 = smov 96   ;;  %s2375_s3 = smov 88   ;;  %vm1512_vm5 = vcmask 130048  }
   0xa   :  { %v1655_v22 = vld [vmem:[%s2839_s7] ss:$0 sm:$0xff]  ;;  %vm2505_vm2 = vmpackc.low %vm284_vm1, %vm284_vm1  ;;  %v2551_v57 = vld [vmem:[%s2834_s2 + $0x8] sm:$0xff]  ;;  %s2376_s11 = smov 80   ;;  %s2377_s12 = smov 72  }
   0xb   :  { %2025 = vmatpush3.bf16.msra.mxu0 %v2022_v13  ;;  %v1650_v27 = vld [vmem:[%s2838_s6] ss:$0 sm:$0xff]  ;;  %v2557_v60 = vld [vmem:[%s2834_s2 + $0x18] sm:$0xff]  ;;  %v2562_v61 = vld [vmem:[%s2834_s2 + $0x10] sm:$0xff]  ;;  %s2378_s13 = smov 8   ;;  %s2379_s14 = smov 16  }
   0xc   :  { %1852 = vmatmul.mubr.msk.f32.vlgmr.msra.gmra.mrb[0].mxu1 %vm48_vm0, %v151_v14  ;;  %v2546_v55 = vld [vmem:[%s2834_s2] sm:$0xff]  ;;  %s2371_s2 = smov 120   ;;  %s2380_s23 = smov 24  }
   0xd   :  { %1854 = vmatprep.mubr.msk.f32.mxu1 %vm48_vm0, %v152_v15  ;;  %s2381_s4 = smov [#allocation2]  }
   0xe   :  { %1838 = vmatmul.mubr.msk.f32.vlgmr.msra.gmra.mrb[0].mxu0 %vm48_vm0, %v34_v16  ;;  %s1639_s1 = sshll.u32 %s2381_s4, 4  ;;  %s1640_s1 = int_to_ptr.vmem [resolvable:$true] %s1639_s1 }
   0xf   :  { %1840 = vmatprep.mubr.msk.f32.mxu0 %vm48_vm0, %v35_v18  ;;  %p2352_p1 = scmp.lt.s32.totalorder %s1640_s1, %s1640_s1 }
  0x10   :  { %1855 = vmatmul.mubr.msk.f32.gmra.mrb[2].mxu1 %vm48_vm0, %v153_v17 }
  0x11   :  { %1857 = vmatprep.mubr.msk.f32.mxu1 %vm48_vm0, %v154_v19 }
  0x12   :  { %1841 = vmatmul.mubr.msk.f32.gmra.mrb[2].mxu0 %vm48_vm0, %v36_v20 }
  0x14   :  { %1858 = vmatmul.mubr.msk.f32.gmra.mrb[4].mxu1 %vm48_vm0, %v155_v21 }
  0xdf   :  { %v1853_v23 = vpop.f32.mrb[0].mxu1 }
  0xe0   :  { %v257_v24 = vadd.f32 %v1853_v23, %v1655_v22  ;;  %v251_v25 = vpop.f32.mrb[1].mxu1 }
  0xe1   :  { %v252_v26 = vadd.f32 %v1655_v22, %v251_v25  ;;  %v1839_v29 = vpop.f32.mrb[0].mxu0 }
  0xe2   :  { %v127_v32 = vpop.f32.mrb[1].mxu0  ;;  %v133_v50 = vadd.f32 %v1839_v29, %v1650_v27 }
  0xe3   :  { %v2034_v30 = vpack.c.bf16 %v257_v24, %v252_v26  ;;  %v1856_v31 = vpop.f32.mrb[2].mxu1  ;;  %v2509_v33 = vpack.i.bf16 %v257_v24, %v252_v26  ;;  %v128_v36 = vadd.f32 %v1650_v27, %v127_v32 }
  0xe4   :  { %v267_v34 = vadd.f32 %v1856_v31, %v1655_v22  ;;  %v261_v35 = vpop.f32.mrb[3].mxu1  ;;  %v2533_v53 = vmul.f32 0.35355338, %v133_v50 }
  0xe5   :  { %2036 = vmatprep.subr.msk.bf16.mxu0 %vm2505_vm2, %v2034_v30  ;;  %v262_v37 = vadd.f32 %v1655_v22, %v261_v35  ;;  %v2515_v38 = vmul.f32 0.35355338, %v128_v36  ;;  %v1842_v39 = vpop.f32.mrb[2].mxu0 }
  0xe6   :  { %2039 = vmatpush3.bf16.xpose.msk.msra.mxu0 %vm2505_vm2, %v2034_v30  ;;  %v137_v42 = vpop.f32.mrb[3].mxu0  ;;  %v143_v51 = vadd.f32 %v1842_v39, %v1650_v27 }
  0xe7   :  { %v2040_v40 = vpack.c.bf16 %v267_v34, %v262_v37  ;;  %v1859_v41 = vpop.f32.mrb[4].mxu1  ;;  %v2517_v43 = vpack.i.bf16 %v267_v34, %v262_v37  ;;  %1872 = vmatprep.mubr.msk.f32.mxu0 %vm284_vm1, %v2515_v38  ;;  %v138_v49 = vadd.f32 %v1650_v27, %v137_v42 }
  0xe8   :  { %v277_v44 = vadd.f32 %v1859_v41, %v1655_v22  ;;  %v271_v45 = vpop.f32.mrb[5].mxu1  ;;  %v2535_v54 = vmul.f32 0.35355338, %v143_v51 }
  0xe9   :  { %2042 = vmatprep.subr.msk.bf16.mxu0 %vm2505_vm2, %v2040_v40  ;;  %v272_v46 = vadd.f32 %v1655_v22, %v271_v45  ;;  %v2531_v52 = vmul.f32 0.35355338, %v138_v49 }
  0xeb   :  { %v2046_v47 = vpack.c.bf16 %v277_v44, %v272_v46  ;;  %v2523_v48 = vpack.i.bf16 %v277_v44, %v272_v46 }
  0xee   :  { %2045 = vmatpush3.bf16.xpose.msk.msra.mxu0 %vm2505_vm2, %v2040_v40 }
  0xef   :  { %2048 = vmatprep.subr.msk.bf16.mxu0 %vm2505_vm2, %v2046_v47 }
  0xf6   :  { %2051 = vmatpush3.bf16.xpose.msk.msra.mxu0 %vm2505_vm2, %v2046_v47 }
  0xfd   :  { %1873 = vmatmul.mubr.msk.f32.vlgmr.msra.gmra.mrb[4].mxu0 %vm284_vm1, %v2533_v53 }
  0xfe   :  { %1875 = vmatprep.mubr.msk.f32.mxu0 %vm284_vm1, %v2531_v52 }
 0x101   :  { %1876 = vmatmul.mubr.msk.f32.gmra.mrb[6].mxu0 %vm284_vm1, %v2535_v54 }
 0x1d0   :  { %v1874_v56 = vpop.f32.mrb[4].mxu0 }
 0x1d1   :  { %v381_v58 = vpop.f32.mrb[5].mxu0  ;;  %v387_v62 = vadd.f32 %v1874_v56, %v2551_v57 }
 0x1d2   :  { %v382_v59 = vadd.f32 %v381_v58, %v2546_v55 }
 0x1d3   :  { %v404_v5 = vsel %vm400_vm3, %v387_v62, -inf }
 0x1d4   :  { %v1877_v63 = vpop.f32.mrb[6].mxu0  ;;  %v401_v0 = vsel %vm400_vm3, %v382_v59, -inf }
 0x1d5   :  { %v397_v1 = vadd.f32 %v1877_v63, %v2557_v60  ;;  %402 = vmax.xlane.f32.xlu0 %v401_v0  ;;  %v391_v2 = vpop.f32.mrb[7].mxu0 }
 0x1d6   :  { %v392_v3 = vadd.f32 %v391_v2, %v2562_v61 }
 0x1d7   :  { %v410_v4 = vsel %vm400_vm3, %v397_v1, -inf }
 0x1d8   :  { %411 = vmax.xlane.f32.xlu1 %v410_v4  ;;  %v407_v6 = vsel %vm400_vm3, %v392_v3, -inf }
 0x1d9   :  { %405 = vmax.xlane.f32.xlu0 %v404_v5 }
 0x1dc   :  { %408 = vmax.xlane.f32.xlu1 %v407_v6 }
 0x1ed   :  { %2184 = vrot.lane.b32.xlu1 %v2517_v43, %s2371_s2 }
 0x1ef   :  { %2179 = vrot.lane.b32.xlu0 %v2509_v33, %s2371_s2 }
 0x262   :  { %v403_v7 = vpop.xlane.xlu0 %402 }
 0x263   :  { %v413_v8 = vsub.f32 %v382_v59, %v403_v7 }
 0x265   :  { %v417_v9 = vmul.f32 1.442695, %v413_v8  ;;  %v412_v10 = vpop.xlane.xlu1 %411 }
 0x266   :  { %v416_v11 = vsub.f32 %v397_v1, %v412_v10  ;;  %v406_v12 = vpop.xlane.xlu0 %405 }
 0x267   :  { %2283 = vpow2.f32 %v417_v9  ;;  %v414_v13 = vsub.f32 %v387_v62, %v406_v12 }
 0x268   :  { %v423_v14 = vmul.f32 1.442695, %v416_v11 }
 0x269   :  { %v419_v15 = vmul.f32 1.442695, %v414_v13  ;;  %v409_v16 = vpop.xlane.xlu1 %408 }
 0x26a   :  { %2285 = vpow2.f32 %v423_v14  ;;  %v2180_v17 = vpop.permute.xlu0 %2179  ;;  %v415_v32 = vsub.f32 %v392_v3, %v409_v16 }
 0x26b   :  { %2287 = vpow2.f32 %v419_v15  ;;  %v2182_v18 = vunpack.i.h.bf16 %v2180_v17  ;;  %v2181_v19 = vunpack.i.l.bf16 %v2180_v17 }
 0x26c   :  { %v421_v34 = vmul.f32 1.442695, %v415_v32 }
 0x26d   :  { %v2052_v20 = vpack.c.bf16 %v2182_v18, %v2181_v19  ;;  %v2185_v21 = vpop.permute.xlu1 %2184 }
 0x26e   :  { %v2187_v22 = vunpack.i.h.bf16 %v2185_v21  ;;  %v2186_v23 = vunpack.i.l.bf16 %v2185_v21  ;;  %2289 = vpow2.f32 %v421_v34 }
 0x26f   :  { %2053 = vmatprep.subr.bf16.mxu1 %v2052_v20 }
 0x270   :  { %v2056_v24 = vpack.c.bf16 %v2187_v22, %v2186_v23  ;;  %2055 = vmatpush3.bf16.msra.mxu1 %v2052_v20 }
 0x271   :  { %v2284_v25 = vpop.eup %2283 }
 0x272   :  { %2057 = vmatprep.subr.bf16.mxu1 %v2056_v24  ;;  %v425_v26 = vsel %vm400_vm3, %v2284_v25, 0.0 }
 0x273   :  { %426 = vadd.xlane.f32.xlu0 %v425_v26 }
 0x274   :  { %v2576_v27 = vpop.eup %2285  ;;  %2059 = vmatpush3.bf16.msra.mxu1 %v2056_v24 }
 0x275   :  { %v2288_v29 = vpop.eup %2287  ;;  %v434_v30 = vsel %vm400_vm3, %v2576_v27, 0.0 }
 0x276   :  { %v428_v31 = vsel %vm400_vm3, %v2288_v29, 0.0 }
 0x277   :  { %435 = vadd.xlane.f32.xlu0 %v434_v30  ;;  %429 = vadd.xlane.f32.xlu1 %v428_v31 }
 0x278   :  { %v2290_v35 = vpop.eup %2289 }
 0x279   :  { %v431_v36 = vsel %vm400_vm3, %v2290_v35, 0.0 }
 0x288   :  { %2194 = vrot.lane.b32.xlu1 %v2509_v33, %s2372_s29 }
 0x28c   :  { %2199 = vrot.lane.b32.xlu1 %v2517_v43, %s2372_s29 }
 0x28d   :  { %2189 = vrot.lane.b32.xlu0 %v2523_v48, %s2371_s2 }
 0x291   :  { %572 = vrot.lane.b32.xlu0 %v2515_v38, %s2371_s2 }
 0x295   :  { %576 = vrot.lane.b32.xlu0 %v2531_v52, %s2371_s2 }
 0x2b0   :  { %432 = vadd.xlane.f32.xlu1 %v431_v36 }
 0x2c1   :  { %2204 = vrot.lane.b32.xlu1 %v2523_v48, %s2372_s29 }
 0x2c5   :  { %574 = vrot.lane.b32.xlu1 %v2533_v53, %s2371_s2 }
 0x2c9   :  { %578 = vrot.lane.b32.xlu1 %v2535_v54, %s2371_s2 }
 0x300   :  { %v427_v37 = vpop.xlane.xlu0 %426 }
 0x301   :  { %2291 = vrcp.f32 %v427_v37 }
 0x304   :  { %v430_v39 = vpop.xlane.xlu1 %429  ;;  %v436_v40 = vpop.xlane.xlu0 %435 }
 0x305   :  { %2293 = vrcp.f32 %v430_v39 }
 0x306   :  { %2295 = vrcp.f32 %v436_v40 }
 0x308   :  { %v2195_v41 = vpop.permute.xlu1 %2194  ;;  %v2190_v42 = vpop.permute.xlu0 %2189 }
 0x309   :  { %v2197_v44 = vunpack.i.h.bf16 %v2195_v41  ;;  %v2196_v45 = vunpack.i.l.bf16 %v2195_v41  ;;  %v2192_v46 = vunpack.i.h.bf16 %v2190_v42  ;;  %v2191_v47 = vunpack.i.l.bf16 %v2190_v42 }
 0x30b   :  { %v2292_v49 = vpop.eup %2291  ;;  %v2060_v50 = vpack.c.bf16 %v2192_v46, %v2191_v47  ;;  %v2064_v56 = vpack.c.bf16 %v2197_v44, %v2196_v45 }
 0x30c   :  { %v441_v51 = vmul.f32 %v2292_v49, %v427_v37  ;;  %v2200_v0 = vpop.permute.xlu1 %2199  ;;  %v573_v23 = vpop.permute.xlu0 %572 }
 0x30d   :  { %2061 = vmatprep.subr.bf16.mxu1 %v2060_v50  ;;  %v2202_v4 = vunpack.i.h.bf16 %v2200_v0  ;;  %v2201_v5 = vunpack.i.l.bf16 %v2200_v0 }
 0x30e   :  { %v445_v58 = vsub.f32 2.0, %v441_v51  ;;  %2063 = vmatpush3.bf16.msra.mxu1 %v2060_v50 }
 0x30f   :  { %v2294_v59 = vpop.eup %2293  ;;  %2066 = vmatprep.subr.msk.bf16.mxu1 %vm2505_vm2, %v2064_v56  ;;  %v2070_v7 = vpack.c.bf16 %v2202_v4, %v2201_v5 }
 0x310   :  { %v449_v62 = vmul.f32 %v2292_v49, %v445_v58  ;;  %v442_v63 = vmul.f32 %v2294_v59, %v430_v39  ;;  %v2296_v9 = vpop.eup %2295 }
 0x311   :  { %v444_v13 = vmul.f32 %v2296_v9, %v436_v40 }
 0x312   :  { %v453_v1 = vmul.f32 %v2284_v25, %v449_v62  ;;  %v446_v2 = vsub.f32 2.0, %v442_v63  ;;  %v577_v25 = vpop.permute.xlu0 %576 }
 0x313   :  { %v448_v16 = vsub.f32 2.0, %v444_v13 }
 0x314   :  { %v450_v3 = vmul.f32 %v2294_v59, %v446_v2  ;;  %1890 = vmatprep.mubr.msk.f32.mxu1 %vm400_vm3, %v453_v1 }
 0x315   :  { %v452_v19 = vmul.f32 %v2296_v9, %v448_v16 }
 0x316   :  { %v454_v6 = vmul.f32 %v2288_v29, %v450_v3 }
 0x317   :  { %v456_v22 = vmul.f32 %v2576_v27, %v452_v19 }
 0x318   :  { %1891 = vmatmul.mubr.msk.f32.vlgmr.msra.gmra.mrb[6].mxu1 %vm400_vm3, %v454_v6 }
 0x319   :  { %2069 = vmatpush3.bf16.xpose.msk.msra.mxu1 %vm2505_vm2, %v2064_v56 }
 0x31a   :  { %2072 = vmatprep.subr.msk.bf16.mxu1 %vm2505_vm2, %v2070_v7 }
 0x321   :  { %2075 = vmatpush3.bf16.xpose.msk.msra.mxu1 %vm2505_vm2, %v2070_v7 }
 0x33d   :  { %v433_v8 = vpop.xlane.xlu1 %432 }
 0x33e   :  { %2297 = vrcp.f32 %v433_v8 }
 0x341   :  { %v2205_v10 = vpop.permute.xlu1 %2204 }
 0x342   :  { %v2207_v11 = vunpack.i.h.bf16 %v2205_v10  ;;  %v2206_v12 = vunpack.i.l.bf16 %v2205_v10 }
 0x344   :  { %v2076_v14 = vpack.c.bf16 %v2207_v11, %v2206_v12 }
 0x345   :  { %v575_v24 = vpop.permute.xlu1 %574 }
 0x346   :  { %2078 = vmatprep.subr.msk.bf16.mxu1 %vm2505_vm2, %v2076_v14 }
 0x347   :  { %2081 = vmatpush3.bf16.xpose.msk.msra.mxu1 %vm2505_vm2, %v2076_v14 }
 0x348   :  { %v2298_v15 = vpop.eup %2297 }
 0x349   :  { %v443_v17 = vmul.f32 %v2298_v15, %v433_v8  ;;  %v579_v26 = vpop.permute.xlu1 %578 }
 0x34b   :  { %v447_v18 = vsub.f32 2.0, %v443_v17 }
 0x34d   :  { %v451_v20 = vmul.f32 %v2298_v15, %v447_v18 }
 0x34f   :  { %v455_v21 = vmul.f32 %v2290_v35, %v451_v20 }
 0x351   :  { %1893 = vmatprep.mubr.msk.f32.mxu1 %vm400_vm3, %v455_v21 }
 0x352   :  { %1894 = vmatmul.mubr.msk.f32.gmra.mrb[8].mxu1 %vm400_vm3, %v456_v22 }
 0x353   :  { %1908 = vmatprep.mubr.msk.f32.mxu1 %vm284_vm1, %v573_v23 }
 0x356   :  { %1909 = vmatmul.mubr.msk.f32.vlgmr.msra.gmra.mrb[10].mxu1 %vm284_vm1, %v575_v24 }
 0x357   :  { %1911 = vmatprep.mubr.msk.f32.mxu1 %vm284_vm1, %v577_v25 }
 0x35a   :  { %1912 = vmatmul.mubr.msk.f32.gmra.mrb[12].mxu1 %vm284_vm1, %v579_v26 }
 0x3eb   :  { %v2619_v29 = vpop.f32.mrb[6].mxu1 }
 0x3ec   :  { %v2621_v30 = vpop.f32.mrb[7].mxu1 }
 0x425   :  { %v2623_v27 = vpop.f32.mrb[8].mxu1 }
 0x426   :  { %v2625_v31 = vpop.f32.mrb[9].mxu1 }
 0x429   :  { %v1910_v32 = vpop.f32.mrb[10].mxu1 }
 0x42a   :  { %v684_v34 = vadd.f32 %v1910_v32, %v2551_v57  ;;  %v678_v35 = vpop.f32.mrb[11].mxu1 }
 0x42b   :  { %v679_v36 = vadd.f32 %v678_v35, %v2546_v55 }
 0x42c   :  { %v700_v37 = vsel %vm400_vm3, %v684_v34, -inf }
 0x42d   :  { %701 = vmax.xlane.f32.xlu1 %v700_v37  ;;  %v1913_v39 = vpop.f32.mrb[12].mxu1  ;;  %v697_v40 = vsel %vm400_vm3, %v679_v36, -inf }
 0x42e   :  { %v688_v41 = vpop.f32.mrb[13].mxu1  ;;  %698 = vmax.xlane.f32.xlu0 %v697_v40  ;;  %v694_v44 = vadd.f32 %v1913_v39, %v2557_v60 }
 0x42f   :  { %v689_v42 = vadd.f32 %v688_v41, %v2562_v61 }
 0x430   :  { %v706_v46 = vsel %vm400_vm3, %v694_v44, -inf }
 0x431   :  { %v703_v45 = vsel %vm400_vm3, %v689_v42, -inf }
 0x432   :  { %704 = vmax.xlane.f32.xlu0 %v703_v45 }
 0x436   :  { %707 = vmax.xlane.f32.xlu0 %v706_v46 }
 0x43e   :  { %2214 = vrot.lane.b32.xlu1 %v2517_v43, %s2373_s30 }
 0x44c   :  { %2209 = vrot.lane.b32.xlu0 %v2509_v33, %s2373_s30 }
 0x4ba   :  { %v702_v47 = vpop.xlane.xlu1 %701 }
 0x4bb   :  { %v710_v49 = vsub.f32 %v684_v34, %v702_v47  ;;  %v699_v50 = vpop.xlane.xlu0 %698 }
 0x4bc   :  { %v709_v51 = vsub.f32 %v679_v36, %v699_v50 }
 0x4bd   :  { %v715_v56 = vmul.f32 1.442695, %v710_v49 }
 0x4be   :  { %v713_v58 = vmul.f32 1.442695, %v709_v51  ;;  %v2215_v63 = vpop.permute.xlu1 %2214 }
 0x4bf   :  { %2299 = vpow2.f32 %v715_v56  ;;  %v705_v59 = vpop.xlane.xlu0 %704  ;;  %v2217_v2 = vunpack.i.h.bf16 %v2215_v63  ;;  %v2216_v4 = vunpack.i.l.bf16 %v2215_v63 }
 0x4c0   :  { %2301 = vpow2.f32 %v713_v58  ;;  %v711_v15 = vsub.f32 %v689_v42, %v705_v59 }
 0x4c1   :  { %v2086_v12 = vpack.c.bf16 %v2217_v2, %v2216_v4 }
 0x4c2   :  { %v717_v16 = vmul.f32 1.442695, %v711_v15 }
 0x4c3   :  { %v708_v62 = vpop.xlane.xlu0 %707 }
 0x4c4   :  { %v712_v0 = vsub.f32 %v694_v44, %v708_v62 }
 0x4c6   :  { %v719_v1 = vmul.f32 1.442695, %v712_v0 }
 0x4c7   :  { %v2210_v3 = vpop.permute.xlu0 %2209 }
 0x4c8   :  { %2303 = vpow2.f32 %v719_v1  ;;  %v2212_v5 = vunpack.i.h.bf16 %v2210_v3  ;;  %v2211_v6 = vunpack.i.l.bf16 %v2210_v3 }
 0x4c9   :  { %v2300_v7 = vpop.eup %2299  ;;  %2305 = vpow2.f32 %v717_v16 }
 0x4ca   :  { %v2302_v8 = vpop.eup %2301  ;;  %v2082_v9 = vpack.c.bf16 %v2212_v5, %v2211_v6  ;;  %v724_v10 = vsel %vm400_vm3, %v2300_v7, 0.0 }
 0x4cb   :  { %725 = vadd.xlane.f32.xlu1 %v724_v10  ;;  %v721_v11 = vsel %vm400_vm3, %v2302_v8, 0.0 }
 0x4cc   :  { %722 = vadd.xlane.f32.xlu0 %v721_v11  ;;  %2083 = vmatprep.subr.bf16.mxu0 %v2082_v9 }
 0x4cd   :  { %2085 = vmatpush3.bf16.msra.mxu0 %v2082_v9 }
 0x4ce   :  { %2087 = vmatprep.subr.bf16.mxu0 %v2086_v12 }
 0x4d1   :  { %2089 = vmatpush3.bf16.msra.mxu0 %v2086_v12 }
 0x4d2   :  { %v2641_v13 = vpop.eup %2303 }
 0x4d3   :  { %v730_v14 = vsel %vm400_vm3, %v2641_v13, 0.0  ;;  %v2306_v17 = vpop.eup %2305 }
 0x4d4   :  { %731 = vadd.xlane.f32.xlu0 %v730_v14  ;;  %v727_v18 = vsel %vm400_vm3, %v2306_v17, 0.0 }
 0x4dc   :  { %2224 = vrot.lane.b32.xlu1 %v2509_v33, %s2374_s10 }
 0x4e0   :  { %2229 = vrot.lane.b32.xlu1 %v2517_v43, %s2374_s10 }
 0x4ea   :  { %2219 = vrot.lane.b32.xlu0 %v2523_v48, %s2373_s30 }
 0x4ee   :  { %868 = vrot.lane.b32.xlu0 %v2515_v38, %s2372_s29 }
 0x4f2   :  { %872 = vrot.lane.b32.xlu0 %v2531_v52, %s2372_s29 }
 0x504   :  { %728 = vadd.xlane.f32.xlu1 %v727_v18 }
 0x515   :  { %2234 = vrot.lane.b32.xlu1 %v2523_v48, %s2374_s10 }
 0x519   :  { %870 = vrot.lane.b32.xlu1 %v2533_v53, %s2372_s29 }
 0x51d   :  { %874 = vrot.lane.b32.xlu1 %v2535_v54, %s2372_s29 }
 0x558   :  { %v726_v19 = vpop.xlane.xlu1 %725 }
 0x559   :  { %2307 = vrcp.f32 %v726_v19  ;;  %v723_v20 = vpop.xlane.xlu0 %722 }
 0x55a   :  { %2309 = vrcp.f32 %v723_v20 }
 0x55c   :  { %v2225_v22 = vpop.permute.xlu1 %2224 }
 0x55d   :  { %v2227_v32 = vunpack.i.h.bf16 %v2225_v22  ;;  %v2226_v36 = vunpack.i.l.bf16 %v2225_v22 }
 0x55f   :  { %v2094_v45 = vpack.c.bf16 %v2227_v32, %v2226_v36 }
 0x560   :  { %v2230_v49 = vpop.permute.xlu1 %2229 }
 0x561   :  { %v732_v21 = vpop.xlane.xlu0 %731  ;;  %v2232_v50 = vunpack.i.h.bf16 %v2230_v49  ;;  %v2231_v51 = vunpack.i.l.bf16 %v2230_v49 }
 0x562   :  { %2311 = vrcp.f32 %v732_v21 }
 0x563   :  { %v2308_v23 = vpop.eup %2307  ;;  %v2100_v56 = vpack.c.bf16 %v2232_v50, %v2231_v51 }
 0x564   :  { %v2310_v24 = vpop.eup %2309  ;;  %v738_v25 = vmul.f32 %v2308_v23, %v726_v19 }
 0x565   :  { %v737_v26 = vmul.f32 %v2310_v24, %v723_v20  ;;  %v2220_v34 = vpop.permute.xlu0 %2219 }
 0x566   :  { %v742_v35 = vsub.f32 2.0, %v738_v25  ;;  %v2222_v37 = vunpack.i.h.bf16 %v2220_v34  ;;  %v2221_v39 = vunpack.i.l.bf16 %v2220_v34 }
 0x567   :  { %v741_v40 = vsub.f32 2.0, %v737_v26 }
 0x568   :  { %v746_v41 = vmul.f32 %v2308_v23, %v742_v35  ;;  %v2090_v42 = vpack.c.bf16 %v2222_v37, %v2221_v39 }
 0x569   :  { %v745_v44 = vmul.f32 %v2310_v24, %v741_v40  ;;  %v869_v11 = vpop.permute.xlu0 %868 }
 0x56a   :  { %2091 = vmatprep.subr.bf16.mxu0 %v2090_v42  ;;  %v750_v47 = vmul.f32 %v2300_v7, %v746_v41 }
 0x56b   :  { %v749_v46 = vmul.f32 %v2302_v8, %v745_v44  ;;  %2093 = vmatpush3.bf16.msra.mxu0 %v2090_v42 }
 0x56c   :  { %2096 = vmatprep.subr.msk.bf16.mxu0 %vm2505_vm2, %v2094_v45  ;;  %v2312_v59 = vpop.eup %2311 }
 0x56d   :  { %1926 = vmatprep.mubr.msk.f32.mxu0 %vm400_vm3, %v749_v46  ;;  %v740_v1 = vmul.f32 %v2312_v59, %v732_v21  ;;  %v873_v14 = vpop.permute.xlu0 %872 }
 0x56e   :  { %1927 = vmatmul.mubr.msk.f32.vlgmr.msra.gmra.mrb[8].mxu0 %vm400_vm3, %v750_v47 }
 0x56f   :  { %v744_v4 = vsub.f32 2.0, %v740_v1 }
 0x571   :  { %v748_v7 = vmul.f32 %v2312_v59, %v744_v4 }
 0x573   :  { %v752_v10 = vmul.f32 %v2641_v13, %v748_v7 }
 0x574   :  { %2099 = vmatpush3.bf16.xpose.msk.msra.mxu0 %vm2505_vm2, %v2094_v45 }
 0x575   :  { %2102 = vmatprep.subr.msk.bf16.mxu0 %vm2505_vm2, %v2100_v56 }
 0x57c   :  { %2105 = vmatpush3.bf16.xpose.msk.msra.mxu0 %vm2505_vm2, %v2100_v56 }
 0x591   :  { %v729_v58 = vpop.xlane.xlu1 %728 }
 0x592   :  { %2313 = vrcp.f32 %v729_v58 }
 0x595   :  { %v2235_v62 = vpop.permute.xlu1 %2234 }
 0x596   :  { %v2237_v63 = vunpack.i.h.bf16 %v2235_v62  ;;  %v2236_v0 = vunpack.i.l.bf16 %v2235_v62 }
 0x598   :  { %v2106_v2 = vpack.c.bf16 %v2237_v63, %v2236_v0 }
 0x599   :  { %v871_v12 = vpop.permute.xlu1 %870 }
 0x59a   :  { %2108 = vmatprep.subr.msk.bf16.mxu0 %vm2505_vm2, %v2106_v2 }
 0x59b   :  { %2111 = vmatpush3.bf16.xpose.msk.msra.mxu0 %vm2505_vm2, %v2106_v2 }
 0x59c   :  { %v2314_v3 = vpop.eup %2313 }
 0x59d   :  { %v739_v5 = vmul.f32 %v2314_v3, %v729_v58  ;;  %v875_v15 = vpop.permute.xlu1 %874 }
 0x59f   :  { %v743_v6 = vsub.f32 2.0, %v739_v5 }
 0x5a1   :  { %v747_v8 = vmul.f32 %v2314_v3, %v743_v6 }
 0x5a3   :  { %v751_v9 = vmul.f32 %v2306_v17, %v747_v8 }
 0x5a5   :  { %1929 = vmatprep.mubr.msk.f32.mxu0 %vm400_vm3, %v751_v9 }
 0x5a6   :  { %1930 = vmatmul.mubr.msk.f32.gmra.mrb[10].mxu0 %vm400_vm3, %v752_v10 }
 0x5a7   :  { %1944 = vmatprep.mubr.msk.f32.mxu0 %vm284_vm1, %v869_v11 }
 0x5aa   :  { %1945 = vmatmul.mubr.msk.f32.vlgmr.msra.gmra.mrb[12].mxu0 %vm284_vm1, %v871_v12 }
 0x5ab   :  { %1947 = vmatprep.mubr.msk.f32.mxu0 %vm284_vm1, %v873_v14 }
 0x5ae   :  { %1948 = vmatmul.mubr.msk.f32.gmra.mrb[14].mxu0 %vm284_vm1, %v875_v15 }
 0x641   :  { %v2680_v16 = vpop.f32.mrb[8].mxu0 }
 0x642   :  { %v2682_v17 = vpop.f32.mrb[9].mxu0 }
 0x679   :  { %v2684_v13 = vpop.f32.mrb[10].mxu0 }
 0x67a   :  { %v2686_v18 = vpop.f32.mrb[11].mxu0 }
 0x67d   :  { %v1946_v19 = vpop.f32.mrb[12].mxu0 }
 0x67e   :  { %v980_v20 = vadd.f32 %v1946_v19, %v2551_v57  ;;  %v974_v21 = vpop.f32.mrb[13].mxu0 }
 0x67f   :  { %v975_v22 = vadd.f32 %v974_v21, %v2546_v55 }
 0x680   :  { %v996_v23 = vsel %vm400_vm3, %v980_v20, -inf }
 0x681   :  { %997 = vmax.xlane.f32.xlu1 %v996_v23  ;;  %v1949_v24 = vpop.f32.mrb[14].mxu0  ;;  %v993_v25 = vsel %vm400_vm3, %v975_v22, -inf }
 0x682   :  { %v984_v26 = vpop.f32.mrb[15].mxu0  ;;  %994 = vmax.xlane.f32.xlu0 %v993_v25  ;;  %v990_v34 = vadd.f32 %v1949_v24, %v2557_v60 }
 0x683   :  { %v985_v32 = vadd.f32 %v984_v26, %v2562_v61 }
 0x684   :  { %v1002_v36 = vsel %vm400_vm3, %v990_v34, -inf }
 0x685   :  { %v999_v35 = vsel %vm400_vm3, %v985_v32, -inf }
 0x686   :  { %1000 = vmax.xlane.f32.xlu0 %v999_v35 }
 0x68a   :  { %1003 = vmax.xlane.f32.xlu0 %v1002_v36 }
 0x692   :  { %2244 = vrot.lane.b32.xlu1 %v2517_v43, %s2375_s3 }
 0x6a0   :  { %2239 = vrot.lane.b32.xlu0 %v2509_v33, %s2375_s3 }
 0x70e   :  { %v998_v37 = vpop.xlane.xlu1 %997 }
 0x70f   :  { %v1006_v39 = vsub.f32 %v980_v20, %v998_v37  ;;  %v995_v40 = vpop.xlane.xlu0 %994 }
 0x710   :  { %v1005_v41 = vsub.f32 %v975_v22, %v995_v40 }
 0x711   :  { %v1011_v42 = vmul.f32 1.442695, %v1006_v39 }
 0x712   :  { %v1009_v44 = vmul.f32 1.442695, %v1005_v41  ;;  %v2245_v47 = vpop.permute.xlu1 %2244 }
 0x713   :  { %2315 = vpow2.f32 %v1011_v42  ;;  %v1001_v45 = vpop.xlane.xlu0 %1000  ;;  %v2247_v51 = vunpack.i.h.bf16 %v2245_v47  ;;  %v2246_v58 = vunpack.i.l.bf16 %v2245_v47 }
 0x714   :  { %2317 = vpow2.f32 %v1009_v44  ;;  %v1007_v7 = vsub.f32 %v985_v32, %v1001_v45 }
 0x715   :  { %v2116_v4 = vpack.c.bf16 %v2247_v51, %v2246_v58 }
 0x716   :  { %v1013_v8 = vmul.f32 1.442695, %v1007_v7 }
 0x717   :  { %v1004_v46 = vpop.xlane.xlu0 %1003 }
 0x718   :  { %v1008_v49 = vsub.f32 %v990_v34, %v1004_v46 }
 0x71a   :  { %v1015_v50 = vmul.f32 1.442695, %v1008_v49 }
 0x71b   :  { %v2240_v56 = vpop.permute.xlu0 %2239 }
 0x71c   :  { %2319 = vpow2.f32 %v1015_v50  ;;  %v2242_v59 = vunpack.i.h.bf16 %v2240_v56  ;;  %v2241_v62 = vunpack.i.l.bf16 %v2240_v56 }
 0x71d   :  { %v2316_v63 = vpop.eup %2315  ;;  %2321 = vpow2.f32 %v1013_v8 }
 0x71e   :  { %v2318_v0 = vpop.eup %2317  ;;  %v2112_v1 = vpack.c.bf16 %v2242_v59, %v2241_v62  ;;  %v1020_v2 = vsel %vm400_vm3, %v2316_v63, 0.0 }
 0x71f   :  { %1021 = vadd.xlane.f32.xlu1 %v1020_v2  ;;  %v1017_v3 = vsel %vm400_vm3, %v2318_v0, 0.0 }
 0x720   :  { %1018 = vadd.xlane.f32.xlu0 %v1017_v3  ;;  %2113 = vmatprep.subr.bf16.mxu1 %v2112_v1 }
 0x721   :  { %2115 = vmatpush3.bf16.msra.mxu1 %v2112_v1 }
 0x722   :  { %2117 = vmatprep.subr.bf16.mxu1 %v2116_v4 }
 0x725   :  { %2119 = vmatpush3.bf16.msra.mxu1 %v2116_v4 }
 0x726   :  { %v2702_v5 = vpop.eup %2319 }
 0x727   :  { %v1026_v6 = vsel %vm400_vm3, %v2702_v5, 0.0  ;;  %v2322_v9 = vpop.eup %2321 }
 0x728   :  { %1027 = vadd.xlane.f32.xlu0 %v1026_v6  ;;  %v1023_v10 = vsel %vm400_vm3, %v2322_v9, 0.0 }
 0x730   :  { %2254 = vrot.lane.b32.xlu1 %v2509_v33, %s2376_s11 }
 0x734   :  { %2259 = vrot.lane.b32.xlu1 %v2517_v43, %s2376_s11 }
 0x73e   :  { %2249 = vrot.lane.b32.xlu0 %v2523_v48, %s2375_s3 }
 0x742   :  { %1164 = vrot.lane.b32.xlu0 %v2515_v38, %s2373_s30 }
 0x746   :  { %1168 = vrot.lane.b32.xlu0 %v2531_v52, %s2373_s30 }
 0x758   :  { %1024 = vadd.xlane.f32.xlu1 %v1023_v10 }
 0x769   :  { %2264 = vrot.lane.b32.xlu1 %v2523_v48, %s2376_s11 }
 0x76d   :  { %1166 = vrot.lane.b32.xlu1 %v2533_v53, %s2373_s30 }
 0x771   :  { %1170 = vrot.lane.b32.xlu1 %v2535_v54, %s2373_s30 }
 0x7ac   :  { %v1022_v11 = vpop.xlane.xlu1 %1021 }
 0x7ad   :  { %2323 = vrcp.f32 %v1022_v11  ;;  %v1019_v38 = vpop.xlane.xlu0 %1018 }
 0x7ae   :  { %2325 = vrcp.f32 %v1019_v38 }
 0x7b0   :  { %v2255_v14 = vpop.permute.xlu1 %2254 }
 0x7b1   :  { %v2257_v21 = vunpack.i.h.bf16 %v2255_v14  ;;  %v2256_v24 = vunpack.i.l.bf16 %v2255_v14 }
 0x7b3   :  { %v2124_v35 = vpack.c.bf16 %v2257_v21, %v2256_v24 }
 0x7b4   :  { %v2260_v39 = vpop.permute.xlu1 %2259 }
 0x7b5   :  { %v1028_v12 = vpop.xlane.xlu0 %1027  ;;  %v2262_v40 = vunpack.i.h.bf16 %v2260_v39  ;;  %v2261_v41 = vunpack.i.l.bf16 %v2260_v39 }
 0x7b6   :  { %2327 = vrcp.f32 %v1028_v12 }
 0x7b7   :  { %v2324_v52 = vpop.eup %2323  ;;  %v2130_v42 = vpack.c.bf16 %v2262_v40, %v2261_v41 }
 0x7b8   :  { %v2326_v15 = vpop.eup %2325  ;;  %v1034_v19 = vmul.f32 %v2324_v52, %v1022_v11 }
 0x7b9   :  { %v1033_v20 = vmul.f32 %v2326_v15, %v1019_v38  ;;  %v2250_v22 = vpop.permute.xlu0 %2249 }
 0x7ba   :  { %v1038_v23 = vsub.f32 2.0, %v1034_v19  ;;  %v2252_v25 = vunpack.i.h.bf16 %v2250_v22  ;;  %v2251_v26 = vunpack.i.l.bf16 %v2250_v22 }
 0x7bb   :  { %v1037_v53 = vsub.f32 2.0, %v1033_v20 }
 0x7bc   :  { %v1042_v32 = vmul.f32 %v2324_v52, %v1038_v23  ;;  %v2120_v34 = vpack.c.bf16 %v2252_v25, %v2251_v26 }
 0x7bd   :  { %v1041_v54 = vmul.f32 %v2326_v15, %v1037_v53  ;;  %v1165_v3 = vpop.permute.xlu0 %1164 }
 0x7be   :  { %2121 = vmatprep.subr.bf16.mxu1 %v2120_v34  ;;  %v1046_v37 = vmul.f32 %v2316_v63, %v1042_v32 }
 0x7bf   :  { %v1045_v36 = vmul.f32 %v2318_v0, %v1041_v54  ;;  %2123 = vmatpush3.bf16.msra.mxu1 %v2120_v34 }
 0x7c0   :  { %2126 = vmatprep.subr.msk.bf16.mxu1 %vm2505_vm2, %v2124_v35  ;;  %v2328_v45 = vpop.eup %2327 }
 0x7c1   :  { %1962 = vmatprep.mubr.msk.f32.mxu1 %vm400_vm3, %v1045_v36  ;;  %v1036_v50 = vmul.f32 %v2328_v45, %v1028_v12  ;;  %v1169_v6 = vpop.permute.xlu0 %1168 }
 0x7c2   :  { %1963 = vmatmul.mubr.msk.f32.vlgmr.msra.gmra.mrb[14].mxu1 %vm400_vm3, %v1046_v37 }
 0x7c3   :  { %v1040_v58 = vsub.f32 2.0, %v1036_v50 }
 0x7c5   :  { %v1044_v63 = vmul.f32 %v2328_v45, %v1040_v58 }
 0x7c7   :  { %v1048_v2 = vmul.f32 %v2702_v5, %v1044_v63 }
 0x7c8   :  { %2129 = vmatpush3.bf16.xpose.msk.msra.mxu1 %vm2505_vm2, %v2124_v35 }
 0x7c9   :  { %2132 = vmatprep.subr.msk.bf16.mxu1 %vm2505_vm2, %v2130_v42 }
 0x7d0   :  { %2135 = vmatpush3.bf16.xpose.msk.msra.mxu1 %vm2505_vm2, %v2130_v42 }
 0x7e5   :  { %v1025_v44 = vpop.xlane.xlu1 %1024 }
 0x7e6   :  { %2329 = vrcp.f32 %v1025_v44 }
 0x7e9   :  { %v2265_v46 = vpop.permute.xlu1 %2264 }
 0x7ea   :  { %v2267_v47 = vunpack.i.h.bf16 %v2265_v46  ;;  %v2266_v49 = vunpack.i.l.bf16 %v2265_v46 }
 0x7ec   :  { %v2136_v51 = vpack.c.bf16 %v2267_v47, %v2266_v49 }
 0x7ed   :  { %v1167_v4 = vpop.permute.xlu1 %1166 }
 0x7ee   :  { %2138 = vmatprep.subr.msk.bf16.mxu1 %vm2505_vm2, %v2136_v51 }
 0x7ef   :  { %2141 = vmatpush3.bf16.xpose.msk.msra.mxu1 %vm2505_vm2, %v2136_v51 }
 0x7f0   :  { %v2330_v56 = vpop.eup %2329 }
 0x7f1   :  { %v1035_v59 = vmul.f32 %v2330_v56, %v1025_v44  ;;  %v1171_v28 = vpop.permute.xlu1 %1170 }
 0x7f3   :  { %v1039_v62 = vsub.f32 2.0, %v1035_v59 }
 0x7f5   :  { %v1043_v0 = vmul.f32 %v2330_v56, %v1039_v62 }
 0x7f7   :  { %v1047_v1 = vmul.f32 %v2322_v9, %v1043_v0 }
 0x7f9   :  { %1965 = vmatprep.mubr.msk.f32.mxu1 %vm400_vm3, %v1047_v1 }
 0x7fa   :  { %1966 = vmatmul.mubr.msk.f32.gmra.mrb[16].mxu1 %vm400_vm3, %v1048_v2 }
 0x7fb   :  { %1980 = vmatprep.mubr.msk.f32.mxu1 %vm284_vm1, %v1165_v3 }
 0x7fe   :  { %1981 = vmatmul.mubr.msk.f32.vlgmr.msra.gmra.mrb[18].mxu1 %vm284_vm1, %v1167_v4 }
 0x7ff   :  { %1983 = vmatprep.mubr.msk.f32.mxu1 %vm284_vm1, %v1169_v6 }
 0x802   :  { %1984 = vmatmul.mubr.msk.f32.gmra.mrb[20].mxu1 %vm284_vm1, %v1171_v28 }
 0x895   :  { %v1964_v7 = vpop.f32.mrb[14].mxu1 }
 0x896   :  { %v1145_v8 = vpop.f32.mrb[15].mxu1 }
 0x8cd   :  { %v1967_v9 = vpop.f32.mrb[16].mxu1 }
 0x8ce   :  { %v1155_v5 = vpop.f32.mrb[17].mxu1 }
 0x8d1   :  { %v1982_v10 = vpop.f32.mrb[18].mxu1 }
 0x8d2   :  { %v1276_v11 = vadd.f32 %v1982_v10, %v2551_v57  ;;  %v1270_v38 = vpop.f32.mrb[19].mxu1 }
 0x8d3   :  { %v1271_v12 = vadd.f32 %v1270_v38, %v2546_v55 }
 0x8d4   :  { %v1292_v14 = vsel %vm400_vm3, %v1276_v11, -inf }
 0x8d5   :  { %1293 = vmax.xlane.f32.xlu1 %v1292_v14  ;;  %v1985_v52 = vpop.f32.mrb[20].mxu1  ;;  %v1289_v15 = vsel %vm400_vm3, %v1271_v12, -inf }
 0x8d6   :  { %v1280_v19 = vpop.f32.mrb[21].mxu1  ;;  %1290 = vmax.xlane.f32.xlu0 %v1289_v15  ;;  %v1286_v21 = vadd.f32 %v1985_v52, %v2557_v60 }
 0x8d7   :  { %v1281_v20 = vadd.f32 %v1280_v19, %v2562_v61 }
 0x8d8   :  { %v1298_v57 = vsel %vm400_vm3, %v1286_v21, -inf }
 0x8d9   :  { %v1295_v22 = vsel %vm400_vm3, %v1281_v20, -inf }
 0x8da   :  { %1296 = vmax.xlane.f32.xlu0 %v1295_v22 }
 0x8de   :  { %1299 = vmax.xlane.f32.xlu0 %v1298_v57  ;;  %v1524_v57 = vld [vmem:[%s2837_s5 + $0x10] sm:$0xff] }
 0x962   :  { %v1294_v23 = vpop.xlane.xlu1 %1293 }
 0x963   :  { %v1302_v55 = vsub.f32 %v1276_v11, %v1294_v23  ;;  %v1291_v24 = vpop.xlane.xlu0 %1290  ;;  %v1525_v23 = vld [vmem:[%s2837_s5 + $0x18] sm:$0xff] }
 0x964   :  { %v1301_v25 = vsub.f32 %v1271_v12, %v1291_v24 }
 0x965   :  { %v1307_v26 = vmul.f32 1.442695, %v1302_v55  ;;  %v2158_v55 = vpack.c.bf16 %v1525_v23, %v1524_v57 }
 0x966   :  { %v1305_v53 = vmul.f32 1.442695, %v1301_v25 }
 0x967   :  { %2331 = vpow2.f32 %v1307_v26  ;;  %v1297_v32 = vpop.xlane.xlu0 %1296 }
 0x968   :  { %2333 = vpow2.f32 %v1305_v53  ;;  %v1303_v34 = vsub.f32 %v1281_v20, %v1297_v32  ;;  %v1522_v20 = vld [vmem:[%s2837_s5] sm:$0xff] }
 0x96a   :  { %v1309_v54 = vmul.f32 1.442695, %v1303_v34 }
 0x96b   :  { %v1300_v61 = vpop.xlane.xlu0 %1299 }
 0x96c   :  { %2335 = vpow2.f32 %v1309_v54  ;;  %v1304_v60 = vsub.f32 %v1286_v21, %v1300_v61  ;;  %v1523_v21 = vld [vmem:[%s2837_s5 + $0x8] sm:$0xff] }
 0x96d   :  { %v2154_v22 = vpack.c.bf16 %v1523_v21, %v1522_v20 }
 0x96e   :  { %v1311_v35 = vmul.f32 1.442695, %v1304_v60 }
 0x96f   :  { %2162 = vmatprep.subr.bf16.mxu1 %v2154_v22 }
 0x970   :  { %2337 = vpow2.f32 %v1311_v35  ;;  %2164 = vmatpush3.bf16.msra.mxu1 %v2154_v22 }
 0x971   :  { %v2749_v36 = vpop.eup %2331  ;;  %2163 = vmatprep.subr.bf16.mxu1 %v2158_v55 }
 0x972   :  { %v2334_v37 = vpop.eup %2333  ;;  %v1316_v39 = vsel %vm400_vm3, %v2749_v36, 0.0 }
 0x973   :  { %1317 = vadd.xlane.f32.xlu1 %v1316_v39  ;;  %v1313_v40 = vsel %vm400_vm3, %v2334_v37, 0.0 }
 0x974   :  { %1314 = vadd.xlane.f32.xlu0 %v1313_v40  ;;  %2165 = vmatpush3.bf16.msra.mxu1 %v2158_v55 }
 0x976   :  { %v2754_v41 = vpop.eup %2335 }
 0x977   :  { %v1319_v42 = vsel %vm400_vm3, %v2754_v41, 0.0 }
 0x978   :  { %1320 = vadd.xlane.f32.xlu0 %v1319_v42 }
 0x97a   :  { %v2758_v44 = vpop.eup %2337 }
 0x97b   :  { %v1322_v45 = vsel %vm400_vm3, %v2758_v44, 0.0 }
 0x97c   :  { %1323 = vadd.xlane.f32.xlu1 %v1322_v45 }
 0x98d   :  { %2274 = vrot.lane.b32.xlu1 %v2517_v43, %s2377_s12 }
 0x98e   :  { %2269 = vrot.lane.b32.xlu0 %v2509_v33, %s2377_s12 }
 0x991   :  { %2279 = vrot.lane.b32.xlu1 %v2523_v48, %s2377_s12 }
 0x992   :  { %1468 = vrot.lane.b32.xlu0 %v2686_v18, %s2378_s13 }
 0x995   :  { %1464 = vrot.lane.b32.xlu1 %v2682_v17, %s2378_s13 }
 0x996   :  { %1470 = vrot.lane.b32.xlu0 %v2684_v13, %s2378_s13 }
 0x999   :  { %1466 = vrot.lane.b32.xlu1 %v2680_v16, %s2378_s13 }
 0x99a   :  { %1484 = vrot.lane.b32.xlu0 %v1155_v5, %s2379_s14 }
 0x99d   :  { %1480 = vrot.lane.b32.xlu1 %v1145_v8, %s2379_s14 }
 0x99e   :  { %1486 = vrot.lane.b32.xlu0 %v1967_v9, %s2379_s14 }
 0x9a1   :  { %1482 = vrot.lane.b32.xlu1 %v1964_v7, %s2379_s14 }
 0xa00   :  { %v1318_v33 = vpop.xlane.xlu1 %1317 }
 0xa01   :  { %2339 = vrcp.f32 %v1318_v33  ;;  %v1315_v43 = vpop.xlane.xlu0 %1314 }
 0xa02   :  { %2341 = vrcp.f32 %v1315_v43 }
 0xa05   :  { %v1321_v48 = vpop.xlane.xlu0 %1320 }
 0xa06   :  { %2343 = vrcp.f32 %v1321_v48 }
 0xa09   :  { %v1324_v18 = vpop.xlane.xlu1 %1323  ;;  %v2270_v46 = vpop.permute.xlu0 %2269 }
 0xa0a   :  { %2345 = vrcp.f32 %v1324_v18  ;;  %v2272_v17 = vunpack.i.h.bf16 %v2270_v46  ;;  %v2271_v47 = vunpack.i.l.bf16 %v2270_v46 }
 0xa0b   :  { %v2340_v13 = vpop.eup %2339 }
 0xa0c   :  { %v2342_v49 = vpop.eup %2341  ;;  %v1330_v50 = vmul.f32 %v2340_v13, %v1318_v33  ;;  %v2142_v16 = vpack.c.bf16 %v2272_v17, %v2271_v47 }
 0xa0d   :  { %v1329_v51 = vmul.f32 %v2342_v49, %v1315_v43  ;;  %v2275_v56 = vpop.permute.xlu1 %2274  ;;  %v1469_v34 = vpop.permute.xlu0 %1468 }
 0xa0e   :  { %v2277_v58 = vunpack.i.h.bf16 %v2275_v56  ;;  %v2276_v59 = vunpack.i.l.bf16 %v2275_v56  ;;  %2143 = vmatprep.subr.bf16.mxu0 %v2142_v16  ;;  %v1334_v0 = vsub.f32 2.0, %v1330_v50 }
 0xa0f   :  { %v1333_v62 = vsub.f32 2.0, %v1329_v51  ;;  %2145 = vmatpush3.bf16.msra.mxu0 %v2142_v16 }
 0xa10   :  { %v2344_v63 = vpop.eup %2343  ;;  %v2146_v1 = vpack.c.bf16 %v2277_v58, %v2276_v59  ;;  %v1338_v5 = vmul.f32 %v2340_v13, %v1334_v0  ;;  %v1718_v13 = vld [vmem:[%s2840_s8] ss:$0 sm:$0xff]  ;;  %s2347_s8 = scalar_lea.vmem %s1640_s1, 512 }
 0xa11   :  { %v1337_v2 = vmul.f32 %v2342_v49, %v1333_v62  ;;  %v1331_v3 = vmul.f32 %v2344_v63, %v1321_v48  ;;  %v2280_v4 = vpop.permute.xlu1 %2279  ;;  %v1471_v61 = vpop.permute.xlu0 %1470  ;;  %p2348_p0 = scmp.ne.s32.totalorder %s1640_s1, %s2347_s8  ;;  %p2353_p2 = scmp.lt.s32.totalorder %s2347_s8, %s2347_s8 }
 0xa12   :  { %v2282_v6 = vunpack.i.h.bf16 %v2280_v4  ;;  %v2281_v28 = vunpack.i.l.bf16 %v2280_v4  ;;  %2147 = vmatprep.subr.bf16.mxu0 %v2146_v1  ;;  %v1342_v14 = vmul.f32 %v2749_v36, %v1338_v5 }
 0xa13   :  { %v1341_v7 = vmul.f32 %v2334_v37, %v1337_v2  ;;  %v1335_v8 = vsub.f32 2.0, %v1331_v3  ;;  %2149 = vmatpush3.bf16.msra.mxu0 %v2146_v1  ;;  %p2354_p3 = por %p2353_p2, %p2352_p1 }
 0xa14   :  { %v2346_v9 = vpop.eup %2345  ;;  %v2150_v10 = vpack.c.bf16 %v2282_v6, %v2281_v28 }
 0xa15   :  { %v1339_v11 = vmul.f32 %v2344_v63, %v1335_v8  ;;  %v1332_v38 = vmul.f32 %v2346_v9, %v1324_v18  ;;  %1998 = vmatprep.mubr.msk.f32.mxu0 %vm400_vm3, %v1341_v7  ;;  %v1465_v32 = vpop.permute.xlu1 %1464  ;;  %v1485_v35 = vpop.permute.xlu0 %1484  ;;  %p2355_p4 = pnand %p2354_p3, %p2348_p0 }
 0xa16   :  { %2151 = vmatprep.subr.bf16.mxu0 %v2150_v10  ;;  %v1508_v37 = vsel %vm284_vm1, %v2621_v30, %v1465_v32 }
 0xa17   :  { %v1336_v12 = vsub.f32 2.0, %v1332_v38  ;;  %2153 = vmatpush3.bf16.msra.mxu0 %v2150_v10  ;;  %v1343_v52 = vmul.f32 %v2754_v41, %v1339_v11 }
 0xa18   :  { %2155 = vmatprep.subr.bf16.mxu0 %v2154_v22 }
 0xa19   :  { %v1340_v15 = vmul.f32 %v2346_v9, %v1336_v12  ;;  %v1467_v54 = vpop.permute.xlu1 %1466  ;;  %v1487_v39 = vpop.permute.xlu0 %1486 }
 0xa1a   :  { %1999 = vmatmul.mubr.msk.f32.vlgmr.msra.gmra.mrb[16].mxu0 %vm400_vm3, %v1342_v14  ;;  %v1509_v45 = vsel %vm284_vm1, %v2619_v29, %v1467_v54 }
 0xa1b   :  { %v1344_v19 = vmul.f32 %v2758_v44, %v1340_v15  ;;  %2001 = vmatprep.mubr.msk.f32.mxu0 %vm400_vm3, %v1343_v52  ;;  %2157 = vmatpush3.bf16.msra.mxu0 %v2154_v22  ;;  %v1510_v44 = vsel %vm284_vm1, %v2625_v31, %v1469_v34  ;;  %v1511_v31 = vsel %vm284_vm1, %v2623_v27, %v1471_v61 }
 0xa1c   :  { %2159 = vmatprep.subr.bf16.mxu0 %v2158_v55  ;;  %v1515_v33 = vsel %vm1512_vm5, %v1510_v44, %v1485_v35  ;;  %v1516_v17 = vsel %vm1512_vm5, %v1511_v31, %v1487_v39 }
 0xa1d   :  { %v1481_v60 = vpop.permute.xlu1 %1480 }
 0xa1e   :  { %2002 = vmatmul.mubr.msk.f32.gmra.mrb[18].mxu0 %vm400_vm3, %v1344_v19  ;;  %v1513_v40 = vsel %vm1512_vm5, %v1508_v37, %v1481_v60 }
 0xa1f   :  { %2161 = vmatpush3.bf16.msra.mxu0 %v2158_v55 }
 0xa21   :  { %v1483_v36 = vpop.permute.xlu1 %1482 }
 0xa22   :  { %v1514_v43 = vsel %vm1512_vm5, %v1509_v45, %v1483_v36 }
 0xaed   :  { %v2000_v24 = vpop.f32.mrb[16].mxu0 }
 0xaee   :  { %v1441_v25 = vpop.f32.mrb[17].mxu0 }
 0xaef   :  { %1496 = vrot.lane.b32.xlu1 %v1441_v25, %s2380_s23 }
 0xaf1   :  { %v2003_v26 = vpop.f32.mrb[18].mxu0 }
 0xaf2   :  { %v1451_v53 = vpop.f32.mrb[19].mxu0 }
 0xaf3   :  { %1498 = vrot.lane.b32.xlu1 %v2000_v24, %s2380_s23  ;;  %1500 = vrot.lane.b32.xlu0 %v1451_v53, %s2380_s23 }
 0xaf7   :  { %1502 = vrot.lane.b32.xlu0 %v2003_v26, %s2380_s23 }
 0xb61   :  { %v1497_v41 = vpop.permute.xlu1 %1496 }
 0xb62   :  { %v1518_v42 = vsel %vm1517_vm4, %v1513_v40, %v1497_v41 }
 0xb63   :  { %2012 = vmatprep.mubr.msk.f32.mxu0 %vm48_vm0, %v1518_v42 }
 0xb65   :  { %v1499_v30 = vpop.permute.xlu1 %1498  ;;  %v1501_v48 = vpop.permute.xlu0 %1500 }
 0xb66   :  { %v1519_v18 = vsel %vm1517_vm4, %v1514_v43, %v1499_v30  ;;  %v1520_v46 = vsel %vm1517_vm4, %v1515_v33, %v1501_v48 }
 0xb67   :  { %2013 = vmatmul.mubr.msk.f32.vlgmr.msra.gmra.mrb[20].mxu0 %vm48_vm0, %v1519_v18  ;;  %2015 = vmatprep.mubr.msk.f32.mxu1 %vm48_vm0, %v1520_v46 }
 0xb69   :  { %v1503_v29 = vpop.permute.xlu0 %1502 }
 0xb6a   :  { %v1521_v47 = vsel %vm1517_vm4, %v1516_v17, %v1503_v29 }
 0xb6b   :  { %2016 = vmatmul.mubr.msk.f32.vlgmr.msra.gmra.mrb[22].mxu1 %vm48_vm0, %v1521_v47 }
 0xc3a   :  { %v2014_v49 = vpop.f32.mrb[20].mxu0 }
 0xc3b   :  { %v1617_v50 = vadd.f32 %v2014_v49, %v1718_v13  ;;  %v1611_v16 = vpop.f32.mrb[21].mxu0 }
 0xc3c   :  { %v1612_v51 = vadd.f32 %v1718_v13, %v1611_v16 }
 0xc3d   :  { %1631 = vst.msk [vmem:[#allocation2 + $0x8] sm:$0xff] %vm48_vm0, %v1617_v50 }
 0xc3e   :  { %1630 = vst.msk [vmem:[#allocation2] sm:$0xff] %vm48_vm0, %v1612_v51  ;;  %v2017_v27 = vpop.f32.mrb[22].mxu1 }
 0xc3f   :  { %v1627_v56 = vadd.f32 %v2017_v27, %v1718_v13  ;;  %v1621_v58 = vpop.f32.mrb[23].mxu1 }
 0xc40   :  { %v1622_v59 = vadd.f32 %v1718_v13, %v1621_v58 }
 0xc41   :  { %1633 = vst.msk [vmem:[#allocation2 + $0x18] sm:$0xff] %vm48_vm0, %v1627_v56 }
 0xc42   :  { %1632 = vst.msk [vmem:[#allocation2 + $0x10] sm:$0xff] %vm48_vm0, %v1622_v59 }
 0xc43   :  { %2358 = shalt.err (!%p2355_p4)
}
 0xc44   :  { %s2359_s24 = scalar_lea.hbm %s2841_s9, 512 }
 0xc45   :  { %p2360_p5 = scmp.ne.s32.totalorder %s2841_s9, %s2359_s24  ;;  %p2363_p6 = scmp.lt.u32.totalorder %s2359_s24, %s2841_s9 }
 0xc47   :  { %p2365_p7 = pnand %p2363_p6, %p2360_p5 }
 0xc49   :  { %2368 = shalt.err (!%p2365_p7)
}
 0xc4a   :  { %s2382_s2 = smov 128  }
 0xc4b   :  { %1645 = dma.vmem_to_hbm [thread:$0]  %s1640_s1, 512, %s2841_s9, [#allocation3], %s2382_s2, %s2382_s2, %s2378_s13  }
 0xc4c   :  { %2369 = dma.done.wait [#allocation3], 512  }
 0xc4d   :  { %2370 = vsyncadd [#allocation3], 4294966784 }
 0xc4e   :  { %1649 = vsyncpa [#allocation3], 1 }

</bundles_post_ra>
